<compile_context>
chip_gen: v7x
topology: tpu7x:2x2x1
jax: 0.10.0
libtpu: 0.0.40
codegen_flags: <defaults>
</compile_context>

<pallas_src>
import functools

import jax
import jax.numpy as jnp
from jax.experimental import pallas as pl
from jax.experimental.pallas import tpu as pltpu

_LANE = 128


def _round_up(n, m):
    return ((n + m - 1) // m) * m


def mlp_kernel(x_ref, w1_ref, b1_ref, w2_ref, b2_ref, o_ref, *, compute_dtype):
    # Hot path: two MXU matmuls + VPU bias/ReLU, fused in VMEM on one batch tile.
    x = x_ref[...]
    w1 = w1_ref[...]
    w2 = w2_ref[...]
    if compute_dtype is not None:
        x = x.astype(compute_dtype)
        w1 = w1.astype(compute_dtype)
        w2 = w2.astype(compute_dtype)

    # First matmul, f32 accumulation; bias add + ReLU in f32 on the VPU.
    h = jnp.dot(x, w1, preferred_element_type=jnp.float32) + b1_ref[...]
    h = jnp.maximum(h, 0.0)
    if compute_dtype is not None:
        h = h.astype(compute_dtype)

    y = jnp.dot(h, w2, preferred_element_type=jnp.float32) + b2_ref[...]
    o_ref[...] = y.astype(o_ref.dtype)


def lightweight_forecaster(x, w1, b1, w2, b2, *, tile_b=512, compute_dtype=None):
    """Fused Linear -> ReLU -> Linear.

    x : (B, input_dim)
    w1: (input_dim, hidden_dim)   b1: (hidden_dim,)  (or (1, hidden_dim))
    w2: (hidden_dim, output_dim)  b2: (output_dim,)  (or (1, output_dim))
    returns (B, output_dim)
    """
    B, input_dim = x.shape
    hidden_dim = w1.shape[1]
    output_dim = w2.shape[1]

    b1 = b1.reshape(1, hidden_dim)
    b2 = b2.reshape(1, output_dim)

    # Lane-dense padding of hidden/output dims (zero padding preserves the math:
    # padded hidden cols are ReLU(0)=0 and hit zero rows of W2; padded output
    # cols are sliced off below).
    hid_p = _round_up(hidden_dim, _LANE)
    out_p = _round_up(output_dim, _LANE)

    w1_p = jnp.pad(w1, ((0, 0), (0, hid_p - hidden_dim)))
    b1_p = jnp.pad(b1, ((0, 0), (0, hid_p - hidden_dim))).astype(jnp.float32)
    w2_p = jnp.pad(w2, ((0, hid_p - hidden_dim), (0, out_p - output_dim)))
    b2_p = jnp.pad(b2, ((0, 0), (0, out_p - output_dim))).astype(jnp.float32)

    # Batch tiling: TILE_B rows per grid step (multiple of 8 sublanes), sized
    # well under v7x's 32 MiB scoped-VMEM default even double-buffered
    # (512 x 128 x 4B per buffer for x and out + resident 128x128 weights).
    tile_b = max(8, _round_up(min(tile_b, B), 8))
    b_pad = _round_up(B, tile_b)
    x_p = jnp.pad(x, ((0, b_pad - B), (0, 0)))

    grid = (b_pad // tile_b,)

    # Advisory cost hint for XLA's scheduler around the custom call.
    itemsize = x.dtype.itemsize
    flops = 2 * b_pad * (input_dim * hid_p + hid_p * out_p)
    bytes_accessed = (
        x_p.size * itemsize
        + w1_p.size * w1_p.dtype.itemsize
        + w2_p.size * w2_p.dtype.itemsize
        + (b1_p.size + b2_p.size) * 4
        + b_pad * out_p * itemsize
    )
    cost = pl.CostEstimate(
        flops=flops, transcendentals=0, bytes_accessed=bytes_accessed
    )

    out_padded = pl.pallas_call(
        functools.partial(mlp_kernel, compute_dtype=compute_dtype),
        out_shape=jax.ShapeDtypeStruct((b_pad, out_p), x.dtype),
        grid_spec=pl.GridSpec(
            grid=grid,
            in_specs=[
                pl.BlockSpec((tile_b, input_dim), lambda i: (i, 0)),  # streamed
                pl.BlockSpec((input_dim, hid_p), lambda i: (0, 0)),   # resident
                pl.BlockSpec((1, hid_p), lambda i: (0, 0)),           # resident
                pl.BlockSpec((hid_p, out_p), lambda i: (0, 0)),       # resident
                pl.BlockSpec((1, out_p), lambda i: (0, 0)),           # resident
            ],
            out_specs=pl.BlockSpec((tile_b, out_p), lambda i: (i, 0)),
        ),
        compiler_params=pltpu.CompilerParams(
            # Independent batch tiles -> megacore-shardable on v7x.
            dimension_semantics=("parallel",),
        ),
        cost_estimate=cost,
    )(x_p, w1_p, b1_p, w2_p, b2_p)

    return out_padded[:B, :output_dim]


def init_params(key, input_dim, hidden_dim, output_dim, dtype=jnp.float32):
    # Mimics nn.Linear's uniform(-1/sqrt(fan_in), 1/sqrt(fan_in)) init.
    k1, k2, k3, k4 = jax.random.split(key, 4)
    bound1 = 1.0 / float(jnp.sqrt(input_dim))
    bound2 = 1.0 / float(jnp.sqrt(hidden_dim))
    w1 = jax.random.uniform(k1, (input_dim, hidden_dim), dtype, -bound1, bound1)
    b1 = jax.random.uniform(k2, (hidden_dim,), dtype, -bound1, bound1)
    w2 = jax.random.uniform(k3, (hidden_dim, output_dim), dtype, -bound2, bound2)
    b2 = jax.random.uniform(k4, (output_dim,), dtype, -bound2, bound2)
    return w1, b1, w2, b2


if __name__ == "__main__":
    key = jax.random.PRNGKey(0)
    kx, kp = jax.random.split(key)

    batch, input_dim, hidden_dim, output_dim = 24, 16, 32, 8
    x = jax.random.normal(kx, (batch, input_dim), jnp.float32)
    w1, b1, w2, b2 = init_params(kp, input_dim, hidden_dim, output_dim)

    def ref_fn(xv):
        return jnp.maximum(xv @ w1 + b1[None, :], 0.0) @ w2 + b2[None, :]

    # f32 path, multi-tile grid (tile_b=8 -> 3 grid steps).
    out = lightweight_forecaster(x, w1, b1, w2, b2, tile_b=8)
    jax.block_until_ready(out)
    assert out.shape == (batch, output_dim)
    assert jnp.allclose(out, ref_fn(x), atol=1e-5, rtol=1e-5)

    # Ragged batch (exercises pad-to-tile + slice path).
    x2 = x[:19]
    out2 = lightweight_forecaster(x2, w1, b1, w2, b2, tile_b=8)
    jax.block_until_ready(out2)
    assert out2.shape == (19, output_dim)
    assert jnp.allclose(out2, ref_fn(x2), atol=1e-5, rtol=1e-5)

    # bf16-on-MXU path (f32 accumulation), looser tolerance.
    out3 = lightweight_forecaster(
        x, w1, b1, w2, b2, tile_b=8, compute_dtype=jnp.bfloat16
    )
    jax.block_until_ready(out3)
    assert jnp.allclose(out3, ref_fn(x), atol=5e-2, rtol=5e-2)

    print("KERNEL_OK")
</pallas_src>

<mosaic_0001>
module attributes {stable_mosaic.version = 11 : i64} {
  func.func @mlp_kernel(%arg0: i32, %arg1: memref<8x16xf32, #tpu.memory_space<vmem>>, %arg2: memref<16x128xf32, #tpu.memory_space<vmem>>, %arg3: memref<1x128xf32, #tpu.memory_space<vmem>>, %arg4: memref<128x128xf32, #tpu.memory_space<vmem>>, %arg5: memref<1x128xf32, #tpu.memory_space<vmem>>, %arg6: memref<8x128xf32, #tpu.memory_space<vmem>>) attributes {dimension_semantics = [#tpu.dimension_semantics<parallel>], iteration_bounds = array<i64: 3>, scalar_prefetch = 0 : i64, scratch_operands = 0 : i64, tpu.core_type = #tpu.core_type<tc>, window_params = [{transform_indices = @transform_0, window_bounds = array<i64: 8, 16>}, {pipeline_mode = #tpu.pipeline_mode<synchronous>, transform_indices = @transform_1, window_bounds = array<i64: 16, 128>}, {pipeline_mode = #tpu.pipeline_mode<synchronous>, transform_indices = @transform_2, window_bounds = array<i64: 1, 128>}, {pipeline_mode = #tpu.pipeline_mode<synchronous>, transform_indices = @transform_3, window_bounds = array<i64: 128, 128>}, {pipeline_mode = #tpu.pipeline_mode<synchronous>, transform_indices = @transform_4, window_bounds = array<i64: 1, 128>}, {transform_indices = @transform_5, window_bounds = array<i64: 8, 128>}]} {
    %c0 = arith.constant 0 : index
    %c0_0 = arith.constant 0 : index
    %0 = vector.load %arg1[%c0, %c0_0] : memref<8x16xf32, #tpu.memory_space<vmem>>, vector<8x16xf32>
    %c0_1 = arith.constant 0 : index
    %c0_2 = arith.constant 0 : index
    %1 = vector.load %arg2[%c0_1, %c0_2] : memref<16x128xf32, #tpu.memory_space<vmem>>, vector<16x128xf32>
    %c0_3 = arith.constant 0 : index
    %c0_4 = arith.constant 0 : index
    %2 = vector.load %arg4[%c0_3, %c0_4] : memref<128x128xf32, #tpu.memory_space<vmem>>, vector<128x128xf32>
    %cst = arith.constant dense<0.000000e+00> : vector<8x128xf32>
    %3 = tpu.matmul %0, %1, %cst {dimension_numbers = #tpu.dot_dimension_numbers<[1], [0], [0], [1], [0, 0, 1, 1], [], []>} : vector<8x16xf32>, vector<16x128xf32>, vector<8x128xf32> -> vector<8x128xf32>
    %c0_5 = arith.constant 0 : index
    %c0_6 = arith.constant 0 : index
    %4 = vector.load %arg3[%c0_5, %c0_6] : memref<1x128xf32, #tpu.memory_space<vmem>>, vector<1x128xf32>
    %5 = vector.broadcast %4 : vector<1x128xf32> to vector<8x128xf32>
    %6 = arith.addf %3, %5 : vector<8x128xf32>
    %cst_7 = arith.constant 0.000000e+00 : f32
    %7 = vector.broadcast %cst_7 : f32 to vector<8x128xf32>
    %8 = arith.maximumf %6, %7 : vector<8x128xf32>
    %cst_8 = arith.constant dense<0.000000e+00> : vector<8x128xf32>
    %9 = tpu.matmul %8, %2, %cst_8 {dimension_numbers = #tpu.dot_dimension_numbers<[1], [0], [0], [1], [0, 0, 1, 1], [], []>} : vector<8x128xf32>, vector<128x128xf32>, vector<8x128xf32> -> vector<8x128xf32>
    %c0_9 = arith.constant 0 : index
    %c0_10 = arith.constant 0 : index
    %10 = vector.load %arg5[%c0_9, %c0_10] : memref<1x128xf32, #tpu.memory_space<vmem>>, vector<1x128xf32>
    %11 = vector.broadcast %10 : vector<1x128xf32> to vector<8x128xf32>
    %12 = arith.addf %9, %11 : vector<8x128xf32>
    %c0_11 = arith.constant 0 : index
    %c0_12 = arith.constant 0 : index
    %13 = vector.load %arg6[%c0_11, %c0_12] : memref<8x128xf32, #tpu.memory_space<vmem>>, vector<8x128xf32>
    tpu.vector_store %arg6[%c0_11, %c0_12], %12 {strides = array<i32>} : memref<8x128xf32, #tpu.memory_space<vmem>>, vector<8x128xf32>,
    return
  }
  func.func @transform_0(%arg0: i32) -> (i32, i32) {
    %c0_i32 = arith.constant 0 : i32
    %c0_i32_0 = arith.constant 0 : i32
    return %arg0, %c0_i32 : i32, i32
  }
  func.func @transform_1(%arg0: i32) -> (i32, i32) {
    %c0_i32 = arith.constant 0 : i32
    %c0_i32_0 = arith.constant 0 : i32
    %c0_i32_1 = arith.constant 0 : i32
    return %c0_i32, %c0_i32_0 : i32, i32
  }
  func.func @transform_2(%arg0: i32) -> (i32, i32) {
    %c0_i32 = arith.constant 0 : i32
    %c0_i32_0 = arith.constant 0 : i32
    %c0_i32_1 = arith.constant 0 : i32
    return %c0_i32, %c0_i32_0 : i32, i32
  }
  func.func @transform_3(%arg0: i32) -> (i32, i32) {
    %c0_i32 = arith.constant 0 : i32
    %c0_i32_0 = arith.constant 0 : i32
    %c0_i32_1 = arith.constant 0 : i32
    return %c0_i32, %c0_i32_0 : i32, i32
  }
  func.func @transform_4(%arg0: i32) -> (i32, i32) {
    %c0_i32 = arith.constant 0 : i32
    %c0_i32_0 = arith.constant 0 : i32
    %c0_i32_1 = arith.constant 0 : i32
    return %c0_i32, %c0_i32_0 : i32, i32
  }
  func.func @transform_5(%arg0: i32) -> (i32, i32) {
    %c0_i32 = arith.constant 0 : i32
    %c0_i32_0 = arith.constant 0 : i32
    return %arg0, %c0_i32 : i32, i32
  }
}

</mosaic_0001>

<bundles_post_ra>
// kernel: tpu_custom_call.1
= control target key start
LH: loop header
LB: loop body
LE: loop exit
PB: predicated region body
PF: predicated region fallthrough
CT: control target
= control target key end

     0   :  { %10 = vsyncpa [#allocation3], 0  ;;  %s938_s0 = inlined_call_operand.vmem [shape: f32[24,16], index: 0, kind: input, shape index: {}]   ;;  %s939_s1 = inlined_call_operand.vmem [shape: f32[16,128], index: 1, kind: input, shape index: {}]   ;;  %s940_s2 = inlined_call_operand.vmem [shape: f32[1,128], index: 2, kind: input, shape index: {}]   ;;  %s941_s3 = inlined_call_operand.hbm [shape: f32[128,128], index: 3, kind: input, shape index: {}]   ;;  %s942_s4 = inlined_call_operand.vmem [shape: f32[1,128], index: 4, kind: input, shape index: {}]   ;;  %s943_s5 = inlined_call_operand.hbm [shape: f32[24,128], index: 5, kind: output, shape index: {}]  }
   0x1   :  { %11 = vsyncpa [#allocation4], 0 }
   0x2   :  { %13 = vsyncpa [#allocation4 + $0x1], 0  ;;  %s791_s18 = smov 0   ;;  %s793_s19 = smov 0  }
   0x3   :  { %s795_s20 = smov 0   ;;  %s797_s21 = smov 0  }
   0x4 LB: > { %s812_s22 = sadd.s32 4294967295, %s752_s21   ;;  %s499_s23 = sadd.s32 4294967294, %s752_s21   ;;  %s752_s21 = sphi %s797_s21, %s959_s21   ;;  %s748_s20 = sphi %s795_s20, %s958_s20   ;;  %s744_s19 = sphi %s793_s19, %s957_s19   ;;  %s740_s18 = sphi %s791_s18, %s956_s18  }
   0x5   : > { %s816_s24 = sadd.s32 1, %s752_s21   ;;  %s136_s25 = sadd.s32 1, %s748_s20 }
   0x6   : > { %s133_s26 = ssub.s32 %s752_s21, %s816_s24  ;;  %p146_p0 = scmp.ne.s32.totalorder %s748_s20, %s744_s19 }
   0x7   : > { %p134_p1 = scmp.eq.s32.totalorder %s133_s26, 0  ;;  %p147_p2 = scmp.eq.s32.totalorder %s812_s22, 2 }
   0x8   : > { %p152_p3 = scmp.ne.s32.totalorder %s744_s19, %s740_s18  ;;  %p153_p4 = scmp.eq.s32.totalorder %s499_s23, 2 }
   0x9   : > { %s827_s27 = scalar_select %p134_p1, %s748_s20, %s136_s25  }
   0xa   : > { %p829_p5 = por %p147_p2, %p146_p0  ;;  %p833_p6 = por %p153_p4, %p152_p3 }
   0xb   : > { %p500_p7 = scmp.ge.s32.totalorder %s752_s21, 1  ;;  %p160_p8 = scmp.lt.s32.totalorder %s752_s21, 4 }
   0xc   : > { %s947_s28 = scalar_select %p829_p5, 1, 0 }
   0xd   : > { %s948_s29 = scalar_select %p833_p6, 1, 0 }
   0xe   : > { %p944_p9 = scmp.eq.s32.totalorder %s812_s22, 0  ;;  %p840_p10 = pnand %p500_p7, %p160_p8 }
   0xf   : > { %s754_s6 = smov [#allocation2]   ;;  %s658_s11 = scalar_lea.hbm %s941_s3, 2048 }
  0x10   : > { %s949_s30 = scalar_select %p840_p10, 1, 0 }
  0x11   : > { %s178_s7 = sshll.u32 %s754_s6, 4  ;;  %p609_p11 = pneg %p840_p10  ;;  %s179_s7 = int_to_ptr.vmem [resolvable:$true] %s178_s7 }
  0x12   : > { %p659_p13 = scmp.ne.s32.totalorder %s941_s3, %s658_s11  ;;  %p665_p3 = scmp.lt.u32.totalorder %s658_s11, %s941_s3 }
  0x13   : > { %p848_p12 = pnand %p944_p9, %p609_p11 }
  0x15   : > { %p660_p0 = pneg %p848_p12 }
  0x17   : > { %p661_p1 = pnand %p660_p0, %p659_p13 }
  0x19   : > { %p662_p2 = pneg %p661_p1 }
  0x1b   : > { %p667_p4 = pnand %p665_p3, %p662_p2 }
  0x1d   : > { %670 = shalt.err (!%p667_p4)
}
  0x1e   : > { %s671_s16 = scalar_lea.vmem %s179_s7, 2048  ;;  %p679_p9 = scmp.lt.s32.totalorder %s179_s7, %s179_s7 }
  0x1f   : > { %p672_p7 = scmp.ne.s32.totalorder %s179_s7, %s671_s16  ;;  %p680_p6 = scmp.lt.s32.totalorder %s671_s16, %s671_s16 }
  0x21   : > { %p674_p8 = pnand %p672_p7, %p660_p0  ;;  %p681_p5 = por %p680_p6, %p679_p9 }
  0x23   : > { %p675_p11 = pneg %p674_p8 }
  0x25   : > { %p682_p10 = pnand %p681_p5, %p675_p11 }
  0x27   : > { %685 = shalt.err (!%p682_p10)
}
  0x28   : > { %s755_s17 = smov 128   ;;  %s756_s23 = smov 8  }
  0x29   : > { %612 = dma.hbm_to_vmem [thread:$0]  (!%p848_p12), %s941_s3, 2048, %s179_s7, [#allocation3], %s755_s17, %s755_s17, %s756_s23  }
  0x2a   : > { %p951_p13 = scmp.ne.s32.totalorder %s949_s30, 0 }
  0x2b   : > { %p952_p1 = scmp.eq.s32.totalorder (!%p951_p13), %s812_s22, 0 }
  0x2c   : > { %204 = sbr.rel (%p951_p13) target bundleno = 503 (0x1f7), region = 40 }
  0x33   : > { %731 = dma.done.wait (%p952_p1), [#allocation3], 2048   ;;  %p953_p0 = pmov %p952_p1 }
  0x34   : > { %p231_p5 = scmp.lt.s32.totalorder %s812_s22, 2  ;;  %v757_v0 = vmov 0.0|0.0   ;;  %vm758_vm0 = vmmov 0   ;;  %v759_v1 = vmov 0.0   ;;  %v236_v2 = vld [vmem:[%s939_s1] sm:$0xff]  ;;  %v237_v3 = vld [vmem:[%s939_s1 + $0x8] sm:$0xff] }
  0x35   : > { %733 = vsyncadd (%p953_p0), [#allocation3], 4294965248  ;;  %576 = vmatprep.subr.bf16.mxu0 %v757_v0  ;;  %538 = vmatprep.mubr.msk.f32.mxu0 %vm758_vm0, %v759_v1  ;;  %v577_v4 = vpack.c.bf16 %v237_v3, %v236_v2  ;;  %v238_v5 = vld [vmem:[#allocation2] sm:$0xff]  ;;  %v239_v6 = vld [vmem:[#allocation2 + $0x8] sm:$0xff]  ;;  %vm261_vm1 = vcmask 130048   ;;  %s228_s16 = sand.u32 1, %s744_s19  }
  0x36   : > { %s232_s6 = scalar_select %p231_p5, %s812_s22, 2  ;;  %579 = vmatprep.subr.bf16.mxu1 %v757_v0  ;;  %573 = vmatprep.mubr.msk.f32.mxu1 %vm758_vm0, %v759_v1  ;;  %v240_v7 = vld [vmem:[#allocation2 + $0x10] sm:$0xff]  ;;  %v580_v8 = vpack.c.bf16 %v239_v6, %v238_v5  ;;  %v241_v9 = vld [vmem:[#allocation2 + $0x18] sm:$0xff]  ;;  %v242_v12 = vld [vmem:[#allocation2 + $0x20] sm:$0xff] }
  0x37   : > { %578 = vmatpush3.bf16.msra.mxu0 %v577_v4  ;;  %v583_v11 = vpack.c.bf16 %v241_v9, %v240_v7  ;;  %v243_v13 = vld [vmem:[#allocation2 + $0x28] sm:$0xff]  ;;  %v244_v15 = vld [vmem:[#allocation2 + $0x30] sm:$0xff]  ;;  %v245_v16 = vld [vmem:[#allocation2 + $0x38] sm:$0xff]  ;;  %s505_s17 = sshll.u32 %s228_s16, 3  ;;  %s511_s26 = sshll.u32 %s812_s22, 7 }
  0x38   : > { %s506_s7 = sshll.u32 %s232_s6, 3  ;;  %581 = vmatpush3.bf16.msra.mxu1 %v580_v8  ;;  %v586_v14 = vpack.c.bf16 %v243_v13, %v242_v12  ;;  %v589_v17 = vpack.c.bf16 %v245_v16, %v244_v15  ;;  %v246_v18 = vld [vmem:[#allocation2 + $0x40] sm:$0xff]  ;;  %v247_v19 = vld [vmem:[#allocation2 + $0x48] sm:$0xff]  ;;  %v248_v21 = vld [vmem:[#allocation2 + $0x50] sm:$0xff]  ;;  %s230_s6 = scalar_lea.vmem [#allocation5], %s505_s17 }
  0x39   : > { %s234_s13 = scalar_lea.vmem %s938_s0, %s506_s7  ;;  %582 = vmatprep.subr.bf16.mxu1 %v757_v0  ;;  %v592_v20 = vpack.c.bf16 %v247_v19, %v246_v18  ;;  %v249_v22 = vld [vmem:[#allocation2 + $0x58] sm:$0xff]  ;;  %v250_v24 = vld [vmem:[#allocation2 + $0x60] sm:$0xff]  ;;  %v251_v25 = vld [vmem:[#allocation2 + $0x68] sm:$0xff]  ;;  %s428_s7 = sshll.u32 %s230_s6, 4  ;;  %s898_s7 = int_to_ptr.vmem [resolvable:$true] %s428_s7 }
  0x3a   : > { %v235_v10 = vld [vmem:[%s234_s13] sm:$0xff]  ;;  %v595_v23 = vpack.c.bf16 %v249_v22, %v248_v21  ;;  %v598_v26 = vpack.c.bf16 %v251_v25, %v250_v24  ;;  %v252_v27 = vld [vmem:[#allocation2 + $0x70] sm:$0xff]  ;;  %v253_v28 = vld [vmem:[#allocation2 + $0x78] sm:$0xff]  ;;  %s896_s9 = scalar_lea.hbm %s943_s5, %s511_s26  ;;  %s415_s10 = scalar_lea.sflag [#allocation4], %s228_s16 }
  0x3b   : > { %539 = vmatmul.mubr.msk.f32.vlgmr.msra.gmra.mrb[0].mxu0 %vm261_vm1, %v235_v10  ;;  %v601_v29 = vpack.c.bf16 %v253_v28, %v252_v27  ;;  %v507_v30 = vld [vmem:[%s940_s2] ss:$0 sm:$0xff]  ;;  %s686_s11 = scalar_lea.vmem %s898_s7, 128  ;;  %p954_p9 = scmp.ne.s32.totalorder %s947_s28, 0 }
  0x3c   : > { %584 = vmatpush3.bf16.msra.mxu1 %v583_v11  ;;  %v509_v35 = vld [vmem:[%s942_s4] ss:$0 sm:$0xff]  ;;  %p687_p6 = scmp.ne.s32.totalorder %s898_s7, %s686_s11  ;;  %s760_s22 = smov [#allocation5]  }
  0x3d   : > { %585 = vmatprep.subr.bf16.mxu1 %v757_v0  ;;  %s690_s12 = sshll.u32 %s760_s22, 4  ;;  %s691_s12 = int_to_ptr.vmem [resolvable:$false] %s690_s12 }
  0x3e   : > { %p688_p10 = pnand %p687_p6, %p954_p9  ;;  %s692_s13 = scalar_lea.vmem %s691_s12, 256 }
  0x3f   : > { %p693_p2 = scmp.lt.s32.totalorder %s898_s7, %s691_s12  ;;  %p694_p3 = scmp.lt.s32.totalorder %s692_s13, %s686_s11 }
  0x40   : > { %587 = vmatpush3.bf16.msra.mxu1 %v586_v14  ;;  %p689_p12 = pneg %p688_p10 }
  0x41   : > { %588 = vmatprep.subr.bf16.mxu1 %v757_v0  ;;  %p695_p4 = por %p694_p3, %p693_p2 }
  0x43   : > { %p696_p7 = pnand %p695_p4, %p689_p12 }
  0x44   : > { %590 = vmatpush3.bf16.msra.mxu1 %v589_v17 }
  0x45   : > { %591 = vmatprep.subr.bf16.mxu1 %v757_v0 }
  0x48   : > { %593 = vmatpush3.bf16.msra.mxu1 %v592_v20 }
  0x49   : > { %594 = vmatprep.subr.bf16.mxu1 %v757_v0 }
  0x4c   : > { %596 = vmatpush3.bf16.msra.mxu1 %v595_v23 }
  0x4d   : > { %597 = vmatprep.subr.bf16.mxu1 %v757_v0 }
  0x50   : > { %599 = vmatpush3.bf16.msra.mxu1 %v598_v26 }
  0x51   : > { %600 = vmatprep.subr.bf16.mxu1 %v757_v0 }
  0x54   : > { %602 = vmatpush3.bf16.msra.mxu1 %v601_v29 }
 0x10e   : > { %v331_v31 = vpop.f32.mrb[0].mxu0 }
 0x10f   : > { %v332_v32 = vadd.f32 %v507_v30, %v331_v31  ;;  %v540_v33 = vpop.f32.mrb[1].mxu0 }
 0x111   : > { %v335_v34 = vmax.f32 %v332_v32, 0.0 }
 0x113   : > { %574 = vmatmul.mubr.f32.vlgmr.msra.gmra.mrb[0].mxu1 %v335_v34 }
 0x1e6   : > { %v409_v36 = vpop.f32.mrb[0].mxu1 }
 0x1e7   : > { %v410_v37 = vadd.f32 %v509_v35, %v409_v36  ;;  %v575_v38 = vpop.f32.mrb[1].mxu1 }
 0x1e9   : > { %413 = vst [vmem:[%s230_s6] sm:$0xff] %v410_v37 }
 0x1ea   : > { %699 = shalt.err (!%p696_p7)
}
 0x1eb   : > { %s700_s14 = scalar_lea.hbm %s896_s9, 128  ;;  %s704_s17 = scalar_lea.hbm %s943_s5, 384 }
 0x1ec   : > { %p701_p8 = scmp.ne.s32.totalorder %s896_s9, %s700_s14  ;;  %p705_p1 = scmp.lt.u32.totalorder %s896_s9, %s943_s5 }
 0x1ed   : > { %p706_p0 = scmp.lt.u32.totalorder %s704_s17, %s700_s14  ;;  %p708_p6 = scmp.lt.u32.totalorder %s700_s14, %s896_s9 }
 0x1ee   : > { %p702_p11 = pnand %p701_p8, %p954_p9 }
 0x1ef   : > { %p707_p5 = por %p706_p0, %p705_p1 }
 0x1f0   : > { %p703_p13 = pneg %p702_p11 }
 0x1f1   : > { %p709_p10 = por %p708_p6, %p707_p5 }
 0x1f3   : > { %p710_p12 = pnand %p709_p10, %p703_p13 }
 0x1f5   : > { %713 = shalt.err (!%p710_p12)
}
 0x1f6   : > { %607 = dma.vmem_to_hbm [thread:$0]  (%p954_p9), %s898_s7, 128, %s896_s9, %s415_s10  }
 0x1f7 PF: > { %p619_p2 = scmp.ge.s32.totalorder %s752_s21, 2  ;;  %s440_s26 = sand.u32 1, %s740_s18  }
 0x1f8   : > { %p955_p3 = scmp.ne.s32.totalorder %s948_s29, 0  ;;  %s441_s6 = scalar_lea.sflag [#allocation4], %s440_s26 }
 0x1fa   : > { %p614_p4 = pnand %p619_p2, %p955_p3 }
 0x1fc   : > { %735 = dma.done.wait (!%p614_p4), %s441_s6, 128  }
 0x1fd   : > { %737 = vsyncadd (!%p614_p4), %s441_s6, 4294967168  ;;  %p16_p7 = scmp.ge.s32.totalorder %s816_s24, 5   ;;  %s956_s18 = smov %s744_s19 }
 0x1fe   : > { %s957_s19 = smov %s748_s20  ;;  %s958_s20 = smov %s827_s27 }
 0x1ff   : > { %s959_s21 = smov %s816_s24  ;;  %18 = sbr.rel (!%p16_p7) target bundleno = 4 (0x4), region = 80 }
 0x206   :  { %446 = vsyncpa [#allocation3], 1 }
 0x207   :  { %448 = vsyncpa [#allocation3 + $0x1], 1 }
 0x208   :  { %449 = vsyncpa [#allocation4], 1 }
 0x209   :  { %451 = vsyncpa [#allocation4 + $0x1], 1 }

</bundles_post_ra>
